<compile_context>
chip_gen: v6e
topology: v6e:2x2x1
jax: 0.10.0
libtpu: 0.0.40
codegen_flags: <defaults>
</compile_context>

<pallas_src>
import jax
import jax.numpy as jnp
import numpy as np
from jax.experimental import pallas as pl
from jax.experimental.pallas import tpu as pltpu

_LN_EPS = 1e-5  # torch.nn.LayerNorm default


def _film_fusion_kernel(x_ref, gb_ref, w_ref, b_ref, out_ref):
    # x_ref:   (Bt, N, Din)   activations (f32 or bf16) for Bt batch elements
    # gb_ref:  (Bt, 1, 2E)    f32  packed [gamma(+1) | beta]
    # w_ref:   (Din, E)       bf16 weight-norm-folded linear weight (pre-transposed)
    # b_ref:   (1, E)         f32  linear bias
    # out_ref: (Bt, N, E)     f32 or bf16
    bt, n, din = x_ref.shape
    e = out_ref.shape[-1]

    # Flatten (Bt, N, Din) -> (Bt*N, Din): one tall matmul per grid step fills the
    # MXU M dim.  Layout-preserving as long as N is a multiple of 8 (it is here).
    x2d = x_ref[...].reshape(bt * n, din)
    h = jnp.dot(x2d.astype(jnp.bfloat16), w_ref[...],
                preferred_element_type=jnp.float32) + b_ref[...]           # (Bt*N, E) f32

    # LayerNorm over the feature (lane) axis, no affine.
    mu = jnp.mean(h, axis=-1, keepdims=True)
    hc = h - mu
    var = jnp.mean(hc * hc, axis=-1, keepdims=True)
    hn = (hc * jax.lax.rsqrt(var + _LN_EPS)).reshape(bt, n, e)

    # FiLM conditioning (broadcast over the N axis) + ReLU.  gamma/beta slices are
    # lane-aligned because E is a multiple of 128.
    gamma = gb_ref[:, :, :e]
    beta = gb_ref[:, :, e:]
    out_ref[...] = jnp.maximum(gamma * hn + beta, 0.0).astype(out_ref.dtype)


def _pick_batch_tile(B, N, din, e, x_bytes, out_bytes, vmem_budget_bytes):
    """Largest bt (<= B) whose per-step VMEM footprint fits the budget."""
    # Per batch element per step (double-buffered x/out blocks + f32 temps + bf16 x copy).
    per_b = N * (2 * din * x_bytes          # x block, 2 pipeline buffers
                 + din * 2                  # in-kernel bf16 copy of x
                 + 2 * e * out_bytes        # out block, 2 pipeline buffers
                 + 3 * e * 4)               # f32 h / centered / normalized temps
    per_b += 2 * 8 * 2 * e * 4              # packed gamma/beta row (8-sublane padded), 2 buffers
    fixed = din * e * 2 + 8 * e * 4         # resident bf16 weight + f32 bias
    avail = max(vmem_budget_bytes - fixed, per_b)
    return int(max(1, min(B, avail // per_b)))


def _build_in_specs(bt, N, din, e, single_buffer_weights):
    w_kwargs = {"pipeline_mode": pl.Buffered(1)} if single_buffer_weights else {}
    return [
        pl.BlockSpec((bt, N, din), lambda b: (b, 0, 0)),
        pl.BlockSpec((bt, 1, 2 * e), lambda b: (b, 0, 0)),
        pl.BlockSpec((din, e), lambda b: (0, 0), **w_kwargs),
        pl.BlockSpec((1, e), lambda b: (0, 0), **w_kwargs),
    ]


def film_fusion(x, cond, params, *, out_dtype=jnp.bfloat16,
                vmem_budget_bytes=24 * 1024 * 1024):
    """x: (B, N, in_dim) f32/bf16, cond: (B, cond_dim) f32 -> (B, N, out_dim) out_dtype."""
    B, N, in_dim = x.shape
    E = params["wf"].shape[1]
    x_bytes = jnp.dtype(x.dtype).itemsize
    out_bytes = jnp.dtype(out_dtype).itemsize

    # --- cond branch hoisted out of the kernel (degenerate M=B matmul; plain XLA) ---
    gb = cond @ params["wc"] + params["bc"][0]                             # (B, 2E)
    gb = gb.at[:, :E].add(1.0)                                             # gamma += 1
    gamma_beta = gb.reshape(B, 1, 2 * E)                                   # packed FiLM params

    # Weight fed to the MXU in bf16; f32 accumulation requested in the kernel.
    w_bf16 = params["wf"].astype(jnp.bfloat16)

    # --- batch tile from VMEM budget + ceil-div grid over the batch axis ---
    bt = _pick_batch_tile(B, N, in_dim, E, x_bytes, out_bytes, vmem_budget_bytes)
    steps = int(pl.cdiv(B, bt))
    # v7x has 2 TensorCores: when the grid has >1 step, prefer an even length so the
    # "parallel" axis balances; only do it if the row tile stays MXU-sized.
    if steps > 1 and steps % 2 == 1:
        alt_bt = int(pl.cdiv(B, steps + 1))
        if alt_bt >= 1 and alt_bt * N >= 256:
            bt = alt_bt
            steps = int(pl.cdiv(B, bt))
    grid = (steps,)

    cost = pl.CostEstimate(
        flops=2 * B * N * in_dim * E,
        transcendentals=B * N,  # one rsqrt per row
        bytes_accessed=(B * N * in_dim * x_bytes + in_dim * E * 2 + E * 4
                        + B * 2 * E * 4 + B * N * E * out_bytes),
    )

    def run(single_buffer_weights):
        return pl.pallas_call(
            _film_fusion_kernel,
            out_shape=jax.ShapeDtypeStruct((B, N, E), out_dtype),
            grid=grid,
            in_specs=_build_in_specs(bt, N, in_dim, E, single_buffer_weights),
            out_specs=pl.BlockSpec((bt, N, E), lambda b: (b, 0, 0)),
            compiler_params=pltpu.CompilerParams(
                dimension_semantics=("parallel",),
                vmem_limit_bytes=48 * 1024 * 1024),
            cost_estimate=cost,
        )(x, gamma_beta, w_bf16, params["bf"])

    try:
        return run(True)        # single-buffer the grid-invariant weight/bias
    except Exception:
        return run(False)       # fallback if this jax rejects pl.Buffered(1)


def weight_norm_linear_params(key, in_dim, out_dim):
    """Deterministic init of nn.utils.weight_norm(nn.Linear) -> effective (W^T, b)."""
    kv, kg, kb = jax.random.split(key, 3)
    v = jax.random.normal(kv, (out_dim, in_dim), jnp.float32) * 0.1
    g = jax.random.uniform(kg, (out_dim,), jnp.float32, minval=0.5, maxval=1.5)
    b = jax.random.normal(kb, (out_dim,), jnp.float32) * 0.01
    w = g[:, None] * v / jnp.linalg.norm(v, axis=1, keepdims=True)         # weight-norm, dim=0
    return w.T.astype(jnp.float32), b[None, :].astype(jnp.float32)         # (in, out), (1, out)


def make_params(key, in_dim, cond_dim, out_dim):
    k1, k2 = jax.random.split(key, 2)
    wc, bc = weight_norm_linear_params(k1, cond_dim, out_dim * 2)          # cond_proj_l
    wf, bf = weight_norm_linear_params(k2, in_dim, out_dim)                # film_l linear
    return {"wc": wc, "bc": bc, "wf": wf, "bf": bf}


def reference(x, cond, p):
    """Pure-JAX f32 reference matching the PyTorch FilmFusion forward (eval mode)."""
    E = p["wf"].shape[1]
    gb = cond @ p["wc"] + p["bc"][0]
    gamma = gb[:, :E] + 1.0
    beta = gb[:, E:]
    h = x @ p["wf"] + p["bf"][0]
    mu = h.mean(-1, keepdims=True)
    var = ((h - mu) ** 2).mean(-1, keepdims=True)
    hn = (h - mu) * jax.lax.rsqrt(var + _LN_EPS)
    out = gamma[:, None, :] * hn + beta[:, None, :]
    return jax.nn.relu(out)


if __name__ == "__main__":
    B, N = 8, 16
    in_dim, cond_dim, out_dim = 128, 128, 128

    key = jax.random.PRNGKey(0)
    kx, kc, kp = jax.random.split(key, 3)
    x = jax.random.normal(kx, (B, N, in_dim), jnp.float32)
    cond = jax.random.normal(kc, (B, cond_dim), jnp.float32)
    params = make_params(kp, in_dim, cond_dim, out_dim)

    ref = reference(x, cond, params)

    # Default path: bf16 output (kernel is HBM-bound; bf16 store halves output traffic).
    out_bf16 = jax.block_until_ready(film_fusion(x, cond, params))
    assert out_bf16.shape == (B, N, out_dim) and out_bf16.dtype == jnp.bfloat16
    np.testing.assert_allclose(np.asarray(out_bf16, dtype=np.float32), np.asarray(ref),
                               rtol=3e-2, atol=3e-2)

    # f32 output path (flag) for consumers that need full-precision FiLM outputs.
    out_f32 = jax.block_until_ready(film_fusion(x, cond, params, out_dtype=jnp.float32))
    np.testing.assert_allclose(np.asarray(out_f32), np.asarray(ref), rtol=2e-2, atol=2e-2)

    # TODO(synk): dropout is identity here (eval mode / p=0); training-mode dropout not implemented.
    print("KERNEL_OK")
</pallas_src>

<mosaic_0001>
module attributes {stable_mosaic.version = 11 : i64} {
  func.func @_film_fusion_kernel(%arg0: i32, %arg1: memref<8x16x128xf32, #tpu.memory_space<vmem>>, %arg2: memref<8x1x256xf32, #tpu.memory_space<vmem>>, %arg3: memref<128x128xbf16, #tpu.memory_space<vmem>>, %arg4: memref<1x128xf32, #tpu.memory_space<vmem>>, %arg5: memref<8x16x128xbf16, #tpu.memory_space<vmem>>) attributes {dimension_semantics = [#tpu.dimension_semantics<parallel>], iteration_bounds = array<i64: 1>, scalar_prefetch = 0 : i64, scratch_operands = 0 : i64, tpu.core_type = #tpu.core_type<tc>, window_params = [{transform_indices = @transform_0, window_bounds = array<i64: 8, 16, 128>}, {transform_indices = @transform_1, window_bounds = array<i64: 8, 1, 256>}, {pipeline_mode = #tpu.pipeline_mode<synchronous>, transform_indices = @transform_2, window_bounds = array<i64: 128, 128>}, {pipeline_mode = #tpu.pipeline_mode<synchronous>, transform_indices = @transform_3, window_bounds = array<i64: 1, 128>}, {transform_indices = @transform_4, window_bounds = array<i64: 8, 16, 128>}]} {
    %c0 = arith.constant 0 : index
    %c0_0 = arith.constant 0 : index
    %c0_1 = arith.constant 0 : index
    %0 = vector.load %arg1[%c0, %c0_0, %c0_1] : memref<8x16x128xf32, #tpu.memory_space<vmem>>, vector<8x16x128xf32>
    %1 = vector.shape_cast %0 : vector<8x16x128xf32> to vector<128x128xf32>
    %2 = arith.truncf %1 : vector<128x128xf32> to vector<128x128xbf16>
    %c0_2 = arith.constant 0 : index
    %c0_3 = arith.constant 0 : index
    %3 = vector.load %arg3[%c0_2, %c0_3] : memref<128x128xbf16, #tpu.memory_space<vmem>>, vector<128x128xbf16>
    %cst = arith.constant dense<0.000000e+00> : vector<128x128xf32>
    %4 = tpu.matmul %2, %3, %cst {dimension_numbers = #tpu.dot_dimension_numbers<[1], [0], [0], [1], [0, 0, 1, 1], [], []>} : vector<128x128xbf16>, vector<128x128xbf16>, vector<128x128xf32> -> vector<128x128xf32>
    %c0_4 = arith.constant 0 : index
    %c0_5 = arith.constant 0 : index
    %5 = vector.load %arg4[%c0_4, %c0_5] : memref<1x128xf32, #tpu.memory_space<vmem>>, vector<1x128xf32>
    %6 = vector.broadcast %5 : vector<1x128xf32> to vector<128x128xf32>
    %7 = arith.addf %4, %6 : vector<128x128xf32>
    %cst_6 = arith.constant dense<0.000000e+00> : vector<128xf32>
    %8 = vector.multi_reduction <add>, %7, %cst_6 [1] : vector<128x128xf32> to vector<128xf32>
    %9 = vector.shape_cast %8 : vector<128xf32> to vector<128x1xf32>
    %cst_7 = arith.constant 1.280000e+02 : f32
    %10 = vector.broadcast %cst_7 : f32 to vector<128x1xf32>
    %11 = arith.divf %9, %10 : vector<128x1xf32>
    %12 = vector.broadcast %11 : vector<128x1xf32> to vector<128x128xf32>
    %13 = arith.subf %7, %12 : vector<128x128xf32>
    %14 = arith.mulf %13, %13 : vector<128x128xf32>
    %cst_8 = arith.constant dense<0.000000e+00> : vector<128xf32>
    %15 = vector.multi_reduction <add>, %14, %cst_8 [1] : vector<128x128xf32> to vector<128xf32>
    %16 = vector.shape_cast %15 : vector<128xf32> to vector<128x1xf32>
    %cst_9 = arith.constant 1.280000e+02 : f32
    %17 = vector.broadcast %cst_9 : f32 to vector<128x1xf32>
    %18 = arith.divf %16, %17 : vector<128x1xf32>
    %cst_10 = arith.constant 9.99999974E-6 : f32
    %19 = vector.broadcast %cst_10 : f32 to vector<128x1xf32>
    %20 = arith.addf %18, %19 : vector<128x1xf32>
    %21 = math.rsqrt %20 : vector<128x1xf32>
    %22 = vector.broadcast %21 : vector<128x1xf32> to vector<128x128xf32>
    %23 = arith.mulf %13, %22 : vector<128x128xf32>
    %24 = vector.shape_cast %23 : vector<128x128xf32> to vector<8x16x128xf32>
    %c0_11 = arith.constant 0 : index
    %c0_12 = arith.constant 0 : index
    %c0_13 = arith.constant 0 : index
    %25 = vector.load %arg2[%c0_11, %c0_12, %c0_13] : memref<8x1x256xf32, #tpu.memory_space<vmem>>, vector<8x1x128xf32>
    %c0_14 = arith.constant 0 : index
    %c0_15 = arith.constant 0 : index
    %c128 = arith.constant 128 : index
    %26 = vector.load %arg2[%c0_14, %c0_15, %c128] : memref<8x1x256xf32, #tpu.memory_space<vmem>>, vector<8x1x128xf32>
    %27 = vector.broadcast %25 : vector<8x1x128xf32> to vector<8x16x128xf32>
    %28 = arith.mulf %27, %24 : vector<8x16x128xf32>
    %29 = vector.broadcast %26 : vector<8x1x128xf32> to vector<8x16x128xf32>
    %30 = arith.addf %28, %29 : vector<8x16x128xf32>
    %cst_16 = arith.constant 0.000000e+00 : f32
    %31 = vector.broadcast %cst_16 : f32 to vector<8x16x128xf32>
    %32 = arith.maximumf %30, %31 : vector<8x16x128xf32>
    %33 = arith.truncf %32 : vector<8x16x128xf32> to vector<8x16x128xbf16>
    %c0_17 = arith.constant 0 : index
    %c0_18 = arith.constant 0 : index
    %c0_19 = arith.constant 0 : index
    %34 = vector.load %arg5[%c0_17, %c0_18, %c0_19] : memref<8x16x128xbf16, #tpu.memory_space<vmem>>, vector<8x16x128xbf16>
    tpu.vector_store %arg5[%c0_17, %c0_18, %c0_19], %33 {strides = array<i32>} : memref<8x16x128xbf16, #tpu.memory_space<vmem>>, vector<8x16x128xbf16>,
    return
  }
  func.func @transform_0(%arg0: i32) -> (i32, i32, i32) {
    %c0_i32 = arith.constant 0 : i32
    %c0_i32_0 = arith.constant 0 : i32
    %c0_i32_1 = arith.constant 0 : i32
    return %arg0, %c0_i32, %c0_i32_0 : i32, i32, i32
  }
  func.func @transform_1(%arg0: i32) -> (i32, i32, i32) {
    %c0_i32 = arith.constant 0 : i32
    %c0_i32_0 = arith.constant 0 : i32
    %c0_i32_1 = arith.constant 0 : i32
    return %arg0, %c0_i32, %c0_i32_0 : i32, i32, i32
  }
  func.func @transform_2(%arg0: i32) -> (i32, i32) {
    %c0_i32 = arith.constant 0 : i32
    %c0_i32_0 = arith.constant 0 : i32
    %c0_i32_1 = arith.constant 0 : i32
    return %c0_i32, %c0_i32_0 : i32, i32
  }
  func.func @transform_3(%arg0: i32) -> (i32, i32) {
    %c0_i32 = arith.constant 0 : i32
    %c0_i32_0 = arith.constant 0 : i32
    %c0_i32_1 = arith.constant 0 : i32
    return %c0_i32, %c0_i32_0 : i32, i32
  }
  func.func @transform_4(%arg0: i32) -> (i32, i32, i32) {
    %c0_i32 = arith.constant 0 : i32
    %c0_i32_0 = arith.constant 0 : i32
    %c0_i32_1 = arith.constant 0 : i32
    return %arg0, %c0_i32, %c0_i32_0 : i32, i32, i32
  }
}

module attributes {stable_mosaic.version = 11 : i64} {
  func.func @_film_fusion_kernel(%arg0: i32, %arg1: memref<8x16x128xf32, #tpu.memory_space<vmem>>, %arg2: memref<8x1x256xf32, #tpu.memory_space<vmem>>, %arg3: memref<128x128xbf16, #tpu.memory_space<vmem>>, %arg4: memref<1x128xf32, #tpu.memory_space<vmem>>, %arg5: memref<8x16x128xbf16, #tpu.memory_space<vmem>>) attributes {dimension_semantics = [#tpu.dimension_semantics<parallel>], iteration_bounds = array<i64: 1>, scalar_prefetch = 0 : i64, scratch_operands = 0 : i64, tpu.core_type = #tpu.core_type<tc>, window_params = [{transform_indices = @transform_0, window_bounds = array<i64: 8, 16, 128>}, {transform_indices = @transform_1, window_bounds = array<i64: 8, 1, 256>}, {pipeline_mode = #tpu.pipeline_mode<synchronous>, transform_indices = @transform_2, window_bounds = array<i64: 128, 128>}, {pipeline_mode = #tpu.pipeline_mode<synchronous>, transform_indices = @transform_3, window_bounds = array<i64: 1, 128>}, {transform_indices = @transform_4, window_bounds = array<i64: 8, 16, 128>}]} {
    %c0 = arith.constant 0 : index
    %c0_0 = arith.constant 0 : index
    %c0_1 = arith.constant 0 : index
    %0 = vector.load %arg1[%c0, %c0_0, %c0_1] : memref<8x16x128xf32, #tpu.memory_space<vmem>>, vector<8x16x128xf32>
    %1 = vector.shape_cast %0 : vector<8x16x128xf32> to vector<128x128xf32>
    %2 = arith.truncf %1 : vector<128x128xf32> to vector<128x128xbf16>
    %c0_2 = arith.constant 0 : index
    %c0_3 = arith.constant 0 : index
    %3 = vector.load %arg3[%c0_2, %c0_3] : memref<128x128xbf16, #tpu.memory_space<vmem>>, vector<128x128xbf16>
    %cst = arith.constant dense<0.000000e+00> : vector<128x128xf32>
    %4 = tpu.matmul %2, %3, %cst {dimension_numbers = #tpu.dot_dimension_numbers<[1], [0], [0], [1], [0, 0, 1, 1], [], []>} : vector<128x128xbf16>, vector<128x128xbf16>, vector<128x128xf32> -> vector<128x128xf32>
    %c0_4 = arith.constant 0 : index
    %c0_5 = arith.constant 0 : index
    %5 = vector.load %arg4[%c0_4, %c0_5] : memref<1x128xf32, #tpu.memory_space<vmem>>, vector<1x128xf32>
    %6 = vector.broadcast %5 : vector<1x128xf32> to vector<128x128xf32>
    %7 = arith.addf %4, %6 : vector<128x128xf32>
    %cst_6 = arith.constant dense<0.000000e+00> : vector<128xf32>
    %8 = vector.multi_reduction <add>, %7, %cst_6 [1] : vector<128x128xf32> to vector<128xf32>
    %9 = vector.shape_cast %8 : vector<128xf32> to vector<128x1xf32>
    %cst_7 = arith.constant 1.280000e+02 : f32
    %10 = vector.broadcast %cst_7 : f32 to vector<128x1xf32>
    %11 = arith.divf %9, %10 : vector<128x1xf32>
    %12 = vector.broadcast %11 : vector<128x1xf32> to vector<128x128xf32>
    %13 = arith.subf %7, %12 : vector<128x128xf32>
    %14 = arith.mulf %13, %13 : vector<128x128xf32>
    %cst_8 = arith.constant dense<0.000000e+00> : vector<128xf32>
    %15 = vector.multi_reduction <add>, %14, %cst_8 [1] : vector<128x128xf32> to vector<128xf32>
    %16 = vector.shape_cast %15 : vector<128xf32> to vector<128x1xf32>
    %cst_9 = arith.constant 1.280000e+02 : f32
    %17 = vector.broadcast %cst_9 : f32 to vector<128x1xf32>
    %18 = arith.divf %16, %17 : vector<128x1xf32>
    %cst_10 = arith.constant 9.99999974E-6 : f32
    %19 = vector.broadcast %cst_10 : f32 to vector<128x1xf32>
    %20 = arith.addf %18, %19 : vector<128x1xf32>
    %21 = math.rsqrt %20 : vector<128x1xf32>
    %22 = vector.broadcast %21 : vector<128x1xf32> to vector<128x128xf32>
    %23 = arith.mulf %13, %22 : vector<128x128xf32>
    %24 = vector.shape_cast %23 : vector<128x128xf32> to vector<8x16x128xf32>
    %c0_11 = arith.constant 0 : index
    %c0_12 = arith.constant 0 : index
    %c0_13 = arith.constant 0 : index
    %25 = vector.load %arg2[%c0_11, %c0_12, %c0_13] : memref<8x1x256xf32, #tpu.memory_space<vmem>>, vector<8x1x128xf32>
    %c0_14 = arith.constant 0 : index
    %c0_15 = arith.constant 0 : index
    %c128 = arith.constant 128 : index
    %26 = vector.load %arg2[%c0_14, %c0_15, %c128] : memref<8x1x256xf32, #tpu.memory_space<vmem>>, vector<8x1x128xf32>
    %27 = vector.broadcast %25 : vector<8x1x128xf32> to vector<8x16x128xf32>
    %28 = arith.mulf %27, %24 : vector<8x16x128xf32>
    %29 = vector.broadcast %26 : vector<8x1x128xf32> to vector<8x16x128xf32>
    %30 = arith.addf %28, %29 : vector<8x16x128xf32>
    %cst_16 = arith.constant 0.000000e+00 : f32
    %31 = vector.broadcast %cst_16 : f32 to vector<8x16x128xf32>
    %32 = arith.maximumf %30, %31 : vector<8x16x128xf32>
    %33 = arith.truncf %32 : vector<8x16x128xf32> to vector<8x16x128xbf16>
    %c0_17 = arith.constant 0 : index
    %c0_18 = arith.constant 0 : index
    %c0_19 = arith.constant 0 : index
    %34 = vector.load %arg5[%c0_17, %c0_18, %c0_19] : memref<8x16x128xbf16, #tpu.memory_space<vmem>>, vector<8x16x128xbf16>
    tpu.vector_store %arg5[%c0_17, %c0_18, %c0_19], %33 {strides = array<i32>} : memref<8x16x128xbf16, #tpu.memory_space<vmem>>, vector<8x16x128xbf16>,
    return
  }
  func.func @transform_0(%arg0: i32) -> (i32, i32, i32) {
    %c0_i32 = arith.constant 0 : i32
    %c0_i32_0 = arith.constant 0 : i32
    %c0_i32_1 = arith.constant 0 : i32
    return %arg0, %c0_i32, %c0_i32_0 : i32, i32, i32
  }
  func.func @transform_1(%arg0: i32) -> (i32, i32, i32) {
    %c0_i32 = arith.constant 0 : i32
    %c0_i32_0 = arith.constant 0 : i32
    %c0_i32_1 = arith.constant 0 : i32
    return %arg0, %c0_i32, %c0_i32_0 : i32, i32, i32
  }
  func.func @transform_2(%arg0: i32) -> (i32, i32) {
    %c0_i32 = arith.constant 0 : i32
    %c0_i32_0 = arith.constant 0 : i32
    %c0_i32_1 = arith.constant 0 : i32
    return %c0_i32, %c0_i32_0 : i32, i32
  }
  func.func @transform_3(%arg0: i32) -> (i32, i32) {
    %c0_i32 = arith.constant 0 : i32
    %c0_i32_0 = arith.constant 0 : i32
    %c0_i32_1 = arith.constant 0 : i32
    return %c0_i32, %c0_i32_0 : i32, i32
  }
  func.func @transform_4(%arg0: i32) -> (i32, i32, i32) {
    %c0_i32 = arith.constant 0 : i32
    %c0_i32_0 = arith.constant 0 : i32
    %c0_i32_1 = arith.constant 0 : i32
    return %arg0, %c0_i32, %c0_i32_0 : i32, i32, i32
  }
}

</mosaic_0001>

<bundles_post_ra>
// kernel: tpu_custom_call.1
= control target key start
LH: loop header
LB: loop body
LE: loop exit
PB: predicated region body
PF: predicated region fallthrough
CT: control target
= control target key end

     0   :  { %9 = vsyncpa [#allocation3], 0  ;;  %s1155_s0 = inlined_call_operand.hbm [shape: f32[8,16,128], index: 0, kind: input, shape index: {}]   ;;  %s1156_s1 = inlined_call_operand.hbm [shape: f32[8,1,256], index: 1, kind: input, shape index: {}]   ;;  %s1157_s2 = inlined_call_operand.hbm [shape: bf16[128,128], index: 2, kind: input, shape index: {}]   ;;  %s1158_s3 = inlined_call_operand.vmem [shape: f32[1,128], index: 3, kind: input, shape index: {}]   ;;  %s1159_s4 = inlined_call_operand.hbm [shape: bf16[8,16,128], index: 4, kind: output, shape index: {}]  }
   0x1   :  { %10 = vsyncpa [#allocation6], 0 }
   0x2   :  { %11 = vsyncpa [#allocation4], 0  ;;  %s991_s15 = smov [#allocation5]  }
   0x3   :  { %s29_s16 = sshll.u32 %s991_s15, 4  ;;  %s30_s16 = int_to_ptr.vmem [resolvable:$true] %s29_s16 }
   0x4   :  { %s913_s17 = scalar_lea.vmem %s30_s16, 256  ;;  %p918_p1 = scmp.lt.s32.totalorder %s30_s16, %s30_s16 }
   0x5   :  { %p914_p0 = scmp.ne.s32.totalorder %s30_s16, %s913_s17  ;;  %p919_p2 = scmp.lt.s32.totalorder %s913_s17, %s913_s17 }
   0x7   :  { %p920_p3 = por %p919_p2, %p918_p1 }
   0x9   :  { %p921_p4 = pnand %p920_p3, %p914_p0 }
   0xb   :  { %924 = shalt.err (!%p921_p4)
}
   0xc   :  { %s992_s18 = smov 32   ;;  %s993_s19 = smov 2  }
   0xd   :  { %35 = dma.hbm_to_vmem [thread:$0]  %s1156_s1, 256, %s30_s16, [#allocation6], %s992_s18, %s992_s18, %s993_s19  }
   0xe   :  { %s994_s22 = smov [#allocation2]  }
   0xf   :  { %s17_s23 = sshll.u32 %s994_s22, 4  ;;  %s18_s23 = int_to_ptr.vmem [resolvable:$true] %s17_s23 }
  0x10   :  { %s933_s24 = scalar_lea.vmem %s18_s23, 2048  ;;  %p938_p6 = scmp.lt.s32.totalorder %s18_s23, %s18_s23 }
  0x11   :  { %p934_p5 = scmp.ne.s32.totalorder %s18_s23, %s933_s24  ;;  %p939_p7 = scmp.lt.s32.totalorder %s933_s24, %s933_s24 }
  0x13   :  { %p940_p8 = por %p939_p7, %p938_p6 }
  0x15   :  { %p941_p9 = pnand %p940_p8, %p934_p5 }
  0x17   :  { %944 = shalt.err (!%p941_p9)
}
  0x18   :  { %s995_s25 = smov 128   ;;  %s996_s26 = smov 8  }
  0x19   :  { %23 = dma.hbm_to_vmem [thread:$0]  %s1155_s0, 2048, %s18_s23, [#allocation3], %s995_s25, %s995_s25, %s996_s26  }
  0x1a   :  { %s997_s29 = smov [#allocation7]  }
  0x1b   :  { %s41_s30 = sshll.u32 %s997_s29, 4  ;;  %s42_s30 = int_to_ptr.vmem [resolvable:$true] %s41_s30 }
  0x1c   :  { %s953_s1 = scalar_lea.vmem %s42_s30, 1024  ;;  %p958_p11 = scmp.lt.s32.totalorder %s42_s30, %s42_s30 }
  0x1d   :  { %p954_p10 = scmp.ne.s32.totalorder %s42_s30, %s953_s1  ;;  %p959_p12 = scmp.lt.s32.totalorder %s953_s1, %s953_s1 }
  0x1f   :  { %p960_p13 = por %p959_p12, %p958_p11 }
  0x21   :  { %p961_p0 = pnand %p960_p13, %p954_p10 }
  0x23   :  { %964 = shalt.err (!%p961_p0)
}
  0x24   :  { %s998_s5 = smov 64   ;;  %s999_s6 = smov 4  }
  0x25   :  { %47 = dma.hbm_to_vmem [thread:$0]  %s1157_s2, 1024, %s42_s30, [#allocation6], %s998_s5, %s998_s5, %s999_s6  }
  0x26   :  { %985 = dma.done.wait [#allocation3], 2048  }
  0x27   :  { %986 = vsyncadd [#allocation3], 4294965248 }
  0x28   :  { %987 = dma.done.wait [#allocation6], 1280  }
  0x29   :  { %988 = vsyncadd [#allocation6], 4294966016  ;;  %v865_v0 = vld [vmem:[#allocation7 + $0x38] sm:$0xff]   ;;  %v866_v1 = vld [vmem:[#allocation7 + $0x30] sm:$0xff]  }
  0x2a   :  { %807 = vmatprep.subr.bf16.mxu0 %v865_v0  ;;  %839 = vmatprep.subr.bf16.mxu1 %v865_v0  ;;  %v867_v2 = vld [vmem:[#allocation7 + $0x28] sm:$0xff]   ;;  %v868_v3 = vld [vmem:[#allocation7 + $0x20] sm:$0xff]   ;;  %v60_v4 = vld [vmem:[#allocation2] sm:$0xff] }
  0x2b   :  { %808 = vmatpush3.bf16.msra.mxu0 %v865_v0  ;;  %847 = vmatpush3.bf16.msra.mxu1 %v865_v0  ;;  %v61_v5 = vld [vmem:[#allocation2 + $0x8] sm:$0xff]  ;;  %v68_v6 = vld [vmem:[#allocation2 + $0x40] sm:$0xff]  ;;  %v871_v12 = vld [vmem:[#allocation7 + $0x8] sm:$0xff]  }
  0x2c   :  { %809 = vmatprep.subr.bf16.mxu0 %v866_v1  ;;  %840 = vmatprep.subr.bf16.mxu1 %v866_v1  ;;  %v76_v7 = vpack.c.bf16 %v61_v5, %v60_v4  ;;  %v69_v8 = vld [vmem:[#allocation2 + $0x48] sm:$0xff]  ;;  %v870_v11 = vld [vmem:[#allocation7 + $0x10] sm:$0xff]   ;;  %v872_v13 = vld [vmem:[#allocation7] sm:$0xff]  }
  0x2d   :  { %v80_v9 = vpack.c.bf16 %v69_v8, %v68_v6  ;;  %v869_v10 = vld [vmem:[#allocation7 + $0x18] sm:$0xff]   ;;  %v62_v14 = vld [vmem:[#allocation2 + $0x10] sm:$0xff]  ;;  %v63_v15 = vld [vmem:[#allocation2 + $0x18] sm:$0xff] }
  0x2e   :  { %823 = vmatprep.mubr.bf16.mxu0 %v76_v7  ;;  %v70_v16 = vld [vmem:[#allocation2 + $0x50] sm:$0xff]  ;;  %v71_v17 = vld [vmem:[#allocation2 + $0x58] sm:$0xff]  ;;  %v64_v18 = vld [vmem:[#allocation2 + $0x20] sm:$0xff]  ;;  %v77_v22 = vpack.c.bf16 %v63_v15, %v62_v14 }
  0x2f   :  { %810 = vmatpush3.bf16.msra.mxu0 %v866_v1  ;;  %848 = vmatpush3.bf16.msra.mxu1 %v866_v1  ;;  %v65_v19 = vld [vmem:[#allocation2 + $0x28] sm:$0xff]  ;;  %v72_v20 = vld [vmem:[#allocation2 + $0x60] sm:$0xff]  ;;  %v81_v23 = vpack.c.bf16 %v71_v17, %v70_v16  ;;  %v66_v26 = vld [vmem:[#allocation2 + $0x30] sm:$0xff] }
  0x30   :  { %811 = vmatprep.subr.bf16.mxu0 %v867_v2  ;;  %841 = vmatprep.subr.bf16.mxu1 %v867_v2  ;;  %v73_v21 = vld [vmem:[#allocation2 + $0x68] sm:$0xff]  ;;  %v78_v24 = vpack.c.bf16 %v65_v19, %v64_v18  ;;  %v67_v27 = vld [vmem:[#allocation2 + $0x38] sm:$0xff]  ;;  %v74_v28 = vld [vmem:[#allocation2 + $0x70] sm:$0xff] }
  0x31   :  { %831 = vmatprep.mubr.bf16.mxu1 %v80_v9  ;;  %v82_v25 = vpack.c.bf16 %v73_v21, %v72_v20  ;;  %v75_v29 = vld [vmem:[#allocation2 + $0x78] sm:$0xff]  ;;  %v79_v30 = vpack.c.bf16 %v67_v27, %v66_v26  ;;  %v687_v32 = vld [vmem:[%s1158_s3] ss:$0 sm:$0xff]  ;;  %s1000_s3 = smov [#allocation8]  }
  0x32   :  { %v83_v31 = vpack.c.bf16 %v75_v29, %v74_v28  ;;  %s674_s9 = sshll.u32 %s1000_s3, 4  ;;  %s675_s9 = int_to_ptr.vmem [resolvable:$true] %s674_s9 }
  0x33   :  { %812 = vmatpush3.bf16.msra.mxu0 %v867_v2  ;;  %849 = vmatpush3.bf16.msra.mxu1 %v867_v2  ;;  %s965_s10 = scalar_lea.vmem %s675_s9, 1024  ;;  %p970_p2 = scmp.lt.s32.totalorder %s675_s9, %s675_s9 }
  0x34   :  { %813 = vmatprep.subr.bf16.mxu0 %v868_v3  ;;  %842 = vmatprep.subr.bf16.mxu1 %v868_v3  ;;  %p966_p1 = scmp.ne.s32.totalorder %s675_s9, %s965_s10  ;;  %p971_p3 = scmp.lt.s32.totalorder %s965_s10, %s965_s10 }
  0x36   :  { %p972_p4 = por %p971_p3, %p970_p2 }
  0x37   :  { %814 = vmatpush3.bf16.msra.mxu0 %v868_v3  ;;  %850 = vmatpush3.bf16.msra.mxu1 %v868_v3 }
  0x38   :  { %815 = vmatprep.subr.bf16.mxu0 %v869_v10  ;;  %843 = vmatprep.subr.bf16.mxu1 %v869_v10  ;;  %p973_p5 = pnand %p972_p4, %p966_p1 }
  0x3b   :  { %816 = vmatpush3.bf16.msra.mxu0 %v869_v10  ;;  %851 = vmatpush3.bf16.msra.mxu1 %v869_v10 }
  0x3c   :  { %817 = vmatprep.subr.bf16.mxu0 %v870_v11  ;;  %844 = vmatprep.subr.bf16.mxu1 %v870_v11 }
  0x3f   :  { %818 = vmatpush3.bf16.msra.mxu0 %v870_v11  ;;  %852 = vmatpush3.bf16.msra.mxu1 %v870_v11 }
  0x40   :  { %819 = vmatprep.subr.bf16.mxu0 %v871_v12  ;;  %845 = vmatprep.subr.bf16.mxu1 %v871_v12 }
  0x43   :  { %820 = vmatpush3.bf16.msra.mxu0 %v871_v12  ;;  %853 = vmatpush3.bf16.msra.mxu1 %v871_v12 }
  0x44   :  { %821 = vmatprep.subr.bf16.mxu0 %v872_v13  ;;  %846 = vmatprep.subr.bf16.mxu1 %v872_v13 }
  0x47   :  { %822 = vmatpush3.bf16.msra.mxu0 %v872_v13  ;;  %854 = vmatpush3.bf16.msra.mxu1 %v872_v13 }
  0x4a   :  { %824 = vmatmul.mubr.bf16.vlgmr.msra.gmra.mxu0 %v77_v22  ;;  %832 = vmatmul.mubr.bf16.vlgmr.msra.gmra.mxu1 %v81_v23 }
  0x4b   :  { %827 = vmatprep.mubr.bf16.mxu0 %v78_v24  ;;  %835 = vmatprep.mubr.bf16.mxu1 %v82_v25 }
  0x52   :  { %828 = vmatmul.mubr.bf16.gmra.mxu0 %v79_v30  ;;  %836 = vmatmul.mubr.bf16.gmra.mxu1 %v83_v31 }
 0x10a   :  { %v825_v33 = vpop.f32.mrf.mxu0  ;;  %v833_v34 = vpop.f32.mrf.mxu1 }
 0x10b   :  { %v198_v35 = vadd.f32 %v825_v33, %v687_v32  ;;  %v230_v36 = vadd.f32 %v833_v34, %v687_v32 }
 0x10c   :  { %v189_v37 = vpop.f32.mrf.mxu0  ;;  %v221_v38 = vpop.f32.mrf.mxu1 }
 0x10d   :  { %272 = vadd.xlane.f32.xlu0 %v230_v36  ;;  %256 = vadd.xlane.f32.xlu1 %v198_v35  ;;  %v190_v41 = vadd.f32 %v687_v32, %v189_v37  ;;  %v222_v46 = vadd.f32 %v687_v32, %v221_v38 }
 0x10e   :  { %v826_v39 = vpop.f32.mrf.mxu0  ;;  %v834_v40 = vpop.f32.mrf.mxu1 }
 0x10f   :  { %v201_v42 = vadd.f32 %v826_v39, %v687_v32  ;;  %v233_v47 = vadd.f32 %v834_v40, %v687_v32 }
 0x110   :  { %v192_v43 = vpop.f32.mrf.mxu0  ;;  %v224_v44 = vpop.f32.mrf.mxu1 }
 0x111   :  { %258 = vadd.xlane.f32.xlu1 %v201_v42  ;;  %252 = vadd.xlane.f32.xlu0 %v190_v41  ;;  %v193_v50 = vadd.f32 %v687_v32, %v192_v43  ;;  %v225_v51 = vadd.f32 %v687_v32, %v224_v44 }
 0x112   :  { %v829_v45 = vpop.f32.mrf.mxu0  ;;  %v837_v49 = vpop.f32.mrf.mxu1 }
 0x113   :  { %v214_v54 = vadd.f32 %v829_v45, %v687_v32  ;;  %v1056_v63 = vadd.f32 %v837_v49, %v687_v32 }
 0x114   :  { %v205_v48 = vpop.f32.mrf.mxu0  ;;  %v237_v53 = vpop.f32.mrf.mxu1 }
 0x115   :  { %274 = vadd.xlane.f32.xlu1 %v233_v47  ;;  %268 = vadd.xlane.f32.xlu0 %v222_v46  ;;  %v1044_v58 = vadd.f32 %v687_v32, %v205_v48  ;;  %v1050_v61 = vadd.f32 %v687_v32, %v237_v53 }
 0x116   :  { %v830_v52 = vpop.f32.mrf.mxu0  ;;  %v838_v57 = vpop.f32.mrf.mxu1 }
 0x117   :  { %v1041_v55 = vadd.f32 %v830_v52, %v687_v32  ;;  %v1058_v0 = vadd.f32 %v838_v57, %v687_v32 }
 0x118   :  { %v208_v56 = vpop.f32.mrf.mxu0  ;;  %v240_v60 = vpop.f32.mrf.mxu1 }
 0x119   :  { %270 = vadd.xlane.f32.xlu1 %v225_v51  ;;  %254 = vadd.xlane.f32.xlu0 %v193_v50  ;;  %v1046_v59 = vadd.f32 %v687_v32, %v208_v56  ;;  %v1052_v62 = vadd.f32 %v687_v32, %v240_v60 }
 0x11d   :  { %266 = vadd.xlane.f32.xlu1 %v1041_v55  ;;  %264 = vadd.xlane.f32.xlu0 %v214_v54 }
 0x121   :  { %262 = vadd.xlane.f32.xlu1 %v1046_v59  ;;  %260 = vadd.xlane.f32.xlu0 %v1044_v58 }
 0x125   :  { %278 = vadd.xlane.f32.xlu1 %v1052_v62  ;;  %276 = vadd.xlane.f32.xlu0 %v1050_v61 }
 0x129   :  { %282 = vadd.xlane.f32.xlu1 %v1058_v0  ;;  %280 = vadd.xlane.f32.xlu0 %v1056_v63 }
 0x196   :  { %v273_v1 = vpop.xlane.xlu0 %272  ;;  %v257_v2 = vpop.xlane.xlu1 %256 }
 0x197   :  { %v295_v3 = vmul.f32 0.0078125, %v273_v1  ;;  %v287_v4 = vmul.f32 0.0078125, %v257_v2 }
 0x199   :  { %v1062_v5 = vsub.f32 %v198_v35, %v287_v4  ;;  %v1064_v8 = vsub.f32 %v230_v36, %v295_v3 }
 0x19a   :  { %v259_v6 = vpop.xlane.xlu1 %258  ;;  %v253_v7 = vpop.xlane.xlu0 %252 }
 0x19b   :  { %v288_v9 = vmul.f32 0.0078125, %v259_v6  ;;  %v285_v10 = vmul.f32 0.0078125, %v253_v7  ;;  %v319_v11 = vmul.f32 %v1062_v5, %v1062_v5  ;;  %v327_v19 = vmul.f32 %v1064_v8, %v1064_v8 }
 0x19d   :  { %v1068_v12 = vsub.f32 %v201_v42, %v288_v9  ;;  %337 = vadd.xlane.f32.xlu0 %v319_v11  ;;  %v1070_v13 = vsub.f32 %v190_v41, %v285_v10 }
 0x19e   :  { %v275_v14 = vpop.xlane.xlu1 %274  ;;  %v269_v15 = vpop.xlane.xlu0 %268 }
 0x19f   :  { %v296_v16 = vmul.f32 0.0078125, %v275_v14  ;;  %v293_v17 = vmul.f32 0.0078125, %v269_v15  ;;  %v320_v18 = vmul.f32 %v1068_v12, %v1068_v12  ;;  %v317_v23 = vmul.f32 %v1070_v13, %v1070_v13 }
 0x1a1   :  { %v1076_v20 = vsub.f32 %v233_v47, %v296_v16  ;;  %339 = vadd.xlane.f32.xlu1 %v320_v18  ;;  %353 = vadd.xlane.f32.xlu0 %v327_v19  ;;  %v1080_v24 = vsub.f32 %v222_v46, %v293_v17 }
 0x1a2   :  { %v271_v21 = vpop.xlane.xlu1 %270  ;;  %v255_v22 = vpop.xlane.xlu0 %254 }
 0x1a3   :  { %v294_v25 = vmul.f32 0.0078125, %v271_v21  ;;  %v286_v26 = vmul.f32 0.0078125, %v255_v22  ;;  %v328_v27 = vmul.f32 %v1076_v20, %v1076_v20  ;;  %v325_v34 = vmul.f32 %v1080_v24, %v1080_v24 }
 0x1a5   :  { %v1084_v28 = vsub.f32 %v193_v50, %v286_v26  ;;  %355 = vadd.xlane.f32.xlu1 %v328_v27  ;;  %333 = vadd.xlane.f32.xlu0 %v317_v23  ;;  %v1086_v29 = vsub.f32 %v225_v51, %v294_v25 }
 0x1a6   :  { %v267_v30 = vpop.xlane.xlu1 %266  ;;  %v265_v31 = vpop.xlane.xlu0 %264 }
 0x1a7   :  { %v292_v32 = vmul.f32 0.0078125, %v267_v30  ;;  %v291_v33 = vmul.f32 0.0078125, %v265_v31  ;;  %v318_v35 = vmul.f32 %v1084_v28, %v1084_v28  ;;  %v326_v39 = vmul.f32 %v1086_v29, %v1086_v29 }
 0x1a9   :  { %v1092_v36 = vsub.f32 %v214_v54, %v291_v33  ;;  %349 = vadd.xlane.f32.xlu0 %v325_v34  ;;  %335 = vadd.xlane.f32.xlu1 %v318_v35  ;;  %v1097_v40 = vsub.f32 %v1041_v55, %v292_v32  ;;  %v697_v35 = vld [vmem:[#allocation5 + $0x2] ss:$0 sm:$0xff] }
 0x1aa   :  { %v263_v37 = vpop.xlane.xlu1 %262  ;;  %v261_v38 = vpop.xlane.xlu0 %260 }
 0x1ab   :  { %v290_v41 = vmul.f32 0.0078125, %v263_v37  ;;  %v289_v42 = vmul.f32 0.0078125, %v261_v38  ;;  %v323_v43 = vmul.f32 %v1092_v36, %v1092_v36  ;;  %v324_v50 = vmul.f32 %v1097_v40, %v1097_v40 }
 0x1ad   :  { %v1102_v44 = vsub.f32 %v1044_v58, %v289_v42  ;;  %351 = vadd.xlane.f32.xlu1 %v326_v39  ;;  %345 = vadd.xlane.f32.xlu0 %v323_v43  ;;  %v1105_v45 = vsub.f32 %v1046_v59, %v290_v41  ;;  %v705_v43 = vld [vmem:[#allocation5 + $0x3] ss:$0 sm:$0xff] }
 0x1ae   :  { %v279_v46 = vpop.xlane.xlu1 %278  ;;  %v277_v47 = vpop.xlane.xlu0 %276 }
 0x1af   :  { %v298_v48 = vmul.f32 0.0078125, %v279_v46  ;;  %v297_v49 = vmul.f32 0.0078125, %v277_v47  ;;  %v321_v51 = vmul.f32 %v1102_v44, %v1102_v44  ;;  %v322_v55 = vmul.f32 %v1105_v45, %v1105_v45 }
 0x1b1   :  { %v1112_v52 = vsub.f32 %v1050_v61, %v297_v49  ;;  %347 = vadd.xlane.f32.xlu1 %v324_v50  ;;  %341 = vadd.xlane.f32.xlu0 %v321_v51  ;;  %v1117_v56 = vsub.f32 %v1052_v62, %v298_v48 }
 0x1b2   :  { %v283_v53 = vpop.xlane.xlu1 %282  ;;  %v281_v54 = vpop.xlane.xlu0 %280 }
 0x1b3   :  { %v300_v57 = vmul.f32 0.0078125, %v283_v53  ;;  %v299_v58 = vmul.f32 0.0078125, %v281_v54  ;;  %v329_v59 = vmul.f32 %v1112_v52, %v1112_v52  ;;  %v330_v1 = vmul.f32 %v1117_v56, %v1117_v56  ;;  %v701_v53 = vld [vmem:[#allocation5 + $0xa] ss:$0 sm:$0xff] }
 0x1b5   :  { %v1122_v60 = vsub.f32 %v1056_v63, %v299_v58  ;;  %343 = vadd.xlane.f32.xlu1 %v322_v55  ;;  %357 = vadd.xlane.f32.xlu0 %v329_v59  ;;  %v1125_v61 = vsub.f32 %v1058_v0, %v300_v57 }
 0x1b7   :  { %v331_v62 = vmul.f32 %v1122_v60, %v1122_v60  ;;  %v332_v2 = vmul.f32 %v1125_v61, %v1125_v61 }
 0x1b9   :  { %359 = vadd.xlane.f32.xlu1 %v330_v1  ;;  %361 = vadd.xlane.f32.xlu0 %v331_v62  ;;  %v709_v62 = vld [vmem:[#allocation5 + $0xb] ss:$0 sm:$0xff] }
 0x1bd   :  { %363 = vadd.xlane.f32.xlu1 %v332_v2 }
 0x226   :  { %v338_v3 = vpop.xlane.xlu0 %337 }
 0x227   :  { %v367_v63 = vmul.f32 0.0078125, %v338_v3 }
 0x229   :  { %v383_v4 = vadd.f32 1e-05, %v367_v63 }
 0x22a   :  { %v340_v6 = vpop.xlane.xlu1 %339  ;;  %v354_v7 = vpop.xlane.xlu0 %353 }
 0x22b   :  { %873 = vrsqrt.f32 %v383_v4  ;;  %v368_v0 = vmul.f32 0.0078125, %v340_v6  ;;  %v375_v9 = vmul.f32 0.0078125, %v354_v7 }
 0x22d   :  { %v384_v10 = vadd.f32 1e-05, %v368_v0  ;;  %v391_v11 = vadd.f32 1e-05, %v375_v9  ;;  %v696_v0 = vld [vmem:[#allocation5] ss:$0 sm:$0xff] }
 0x22e   :  { %v356_v14 = vpop.xlane.xlu1 %355  ;;  %v334_v15 = vpop.xlane.xlu0 %333 }
 0x22f   :  { %875 = vrsqrt.f32 %v384_v10  ;;  %v376_v16 = vmul.f32 0.0078125, %v356_v14  ;;  %v365_v17 = vmul.f32 0.0078125, %v334_v15 }
 0x230   :  { %877 = vrsqrt.f32 %v391_v11 }
 0x231   :  { %v392_v18 = vadd.f32 1e-05, %v376_v16  ;;  %v381_v19 = vadd.f32 1e-05, %v365_v17 }
 0x232   :  { %v336_v21 = vpop.xlane.xlu1 %335  ;;  %v350_v22 = vpop.xlane.xlu0 %349 }
 0x233   :  { %879 = vrsqrt.f32 %v392_v18  ;;  %v366_v23 = vmul.f32 0.0078125, %v336_v21  ;;  %v373_v25 = vmul.f32 0.0078125, %v350_v22 }
 0x234   :  { %881 = vrsqrt.f32 %v381_v19  ;;  %v704_v19 = vld [vmem:[#allocation5 + $0x1] ss:$0 sm:$0xff] }
 0x235   :  { %v382_v26 = vadd.f32 1e-05, %v366_v23  ;;  %v389_v27 = vadd.f32 1e-05, %v373_v25 }
 0x236   :  { %v352_v30 = vpop.xlane.xlu1 %351  ;;  %v346_v31 = vpop.xlane.xlu0 %345 }
 0x237   :  { %883 = vrsqrt.f32 %v382_v26  ;;  %v374_v32 = vmul.f32 0.0078125, %v352_v30  ;;  %v371_v33 = vmul.f32 0.0078125, %v346_v31  ;;  %v700_v31 = vld [vmem:[#allocation5 + $0x8] ss:$0 sm:$0xff] }
 0x238   :  { %v874_v34 = vpop.eup %873  ;;  %885 = vrsqrt.f32 %v389_v27 }
 0x239   :  { %v415_v37 = vmul.f32 %v874_v34, %v1062_v5  ;;  %v390_v38 = vadd.f32 1e-05, %v374_v32  ;;  %v387_v39 = vadd.f32 1e-05, %v371_v33 }
 0x23a   :  { %v348_v41 = vpop.xlane.xlu1 %347  ;;  %v342_v42 = vpop.xlane.xlu0 %341 }
 0x23b   :  { %v495_v46 = vmul.f32 %v697_v35, %v415_v37  ;;  %887 = vrsqrt.f32 %v390_v38  ;;  %v372_v47 = vmul.f32 0.0078125, %v348_v41  ;;  %v369_v48 = vmul.f32 0.0078125, %v342_v42 }
 0x23c   :  { %v876_v49 = vpop.eup %875  ;;  %889 = vrsqrt.f32 %v387_v39 }
 0x23d   :  { %v878_v50 = vpop.eup %877  ;;  %v416_v51 = vmul.f32 %v876_v49, %v1068_v12  ;;  %v388_v54 = vadd.f32 1e-05, %v372_v47  ;;  %v385_v55 = vadd.f32 1e-05, %v369_v48  ;;  %v559_v57 = vadd.f32 %v705_v43, %v495_v46 }
 0x23e   :  { %v423_v5 = vmul.f32 %v878_v50, %v1064_v8  ;;  %v344_v58 = vpop.xlane.xlu1 %343  ;;  %v358_v59 = vpop.xlane.xlu0 %357  ;;  %v699_v50 = vld [vmem:[#allocation5 + $0x6] ss:$0 sm:$0xff] }
 0x23f   :  { %v496_v1 = vmul.f32 %v697_v35, %v416_v51  ;;  %891 = vrsqrt.f32 %v388_v54  ;;  %v370_v2 = vmul.f32 0.0078125, %v344_v58  ;;  %v377_v4 = vmul.f32 0.0078125, %v358_v59  ;;  %v707_v58 = vld [vmem:[#allocation5 + $0x7] ss:$0 sm:$0xff] }
 0x240   :  { %v880_v3 = vpop.eup %879  ;;  %v503_v63 = vmul.f32 %v701_v53, %v423_v5  ;;  %893 = vrsqrt.f32 %v385_v55  ;;  %v575_v10 = vmax.f32 %v559_v57, 0.0 }
 0x241   :  { %v882_v6 = vpop.eup %881  ;;  %v560_v7 = vadd.f32 %v705_v43, %v496_v1  ;;  %v424_v12 = vmul.f32 %v880_v3, %v1076_v20  ;;  %v386_v9 = vadd.f32 1e-05, %v370_v2  ;;  %v393_v14 = vadd.f32 1e-05, %v377_v4  ;;  %v708_v43 = vld [vmem:[#allocation5 + $0x9] ss:$0 sm:$0xff] }
 0x242   :  { %v567_v11 = vadd.f32 %v709_v62, %v503_v63  ;;  %v413_v8 = vmul.f32 %v882_v6, %v1070_v13  ;;  %v360_v15 = vpop.xlane.xlu1 %359  ;;  %v362_v16 = vpop.xlane.xlu0 %361  ;;  %v698_v63 = vld [vmem:[#allocation5 + $0x4] ss:$0 sm:$0xff] }
 0x243   :  { %v576_v17 = vmax.f32 %v560_v7, 0.0  ;;  %v504_v18 = vmul.f32 %v701_v53, %v424_v12  ;;  %895 = vrsqrt.f32 %v386_v9  ;;  %v378_v21 = vmul.f32 0.0078125, %v360_v15  ;;  %v702_v15 = vld [vmem:[#allocation5 + $0xc] ss:$0 sm:$0xff] }
 0x244   :  { %v884_v22 = vpop.eup %883  ;;  %v493_v23 = vmul.f32 %v696_v0, %v413_v8  ;;  %897 = vrsqrt.f32 %v393_v14  ;;  %v379_v25 = vmul.f32 0.0078125, %v362_v16  ;;  %v583_v13 = vmax.f32 %v567_v11, 0.0 }
 0x245   :  { %v886_v26 = vpop.eup %885  ;;  %v752_v20 = vpack.c.bf16 %v576_v17, %v575_v10  ;;  %v568_v27 = vadd.f32 %v709_v62, %v504_v18  ;;  %v414_v30 = vmul.f32 %v884_v22, %v1084_v28  ;;  %v394_v32 = vadd.f32 1e-05, %v378_v21  ;;  %v710_v21 = vld [vmem:[#allocation5 + $0xd] ss:$0 sm:$0xff] }
 0x246   :  { %v557_v33 = vadd.f32 %v704_v19, %v493_v23  ;;  %v421_v34 = vmul.f32 %v886_v26, %v1080_v24  ;;  %v395_v35 = vadd.f32 1e-05, %v379_v25  ;;  %v364_v37 = vpop.xlane.xlu1 %363 }
 0x247   :  { %784 = vst [vmem:[#allocation8 + $0x8] sm:$0xff] %v752_v20   ;;  %v584_v38 = vmax.f32 %v568_v27, 0.0  ;;  %v494_v39 = vmul.f32 %v696_v0, %v414_v30  ;;  %899 = vrsqrt.f32 %v394_v32  ;;  %v380_v41 = vmul.f32 0.0078125, %v364_v37  ;;  %v706_v0 = vld [vmem:[#allocation5 + $0x5] ss:$0 sm:$0xff] }
 0x248   :  { %v888_v42 = vpop.eup %887  ;;  %v501_v46 = vmul.f32 %v700_v31, %v421_v34  ;;  %901 = vrsqrt.f32 %v395_v35  ;;  %v573_v53 = vmax.f32 %v557_v33, 0.0  ;;  %v703_v27 = vld [vmem:[#allocation5 + $0xe] ss:$0 sm:$0xff]  ;;  %v711_v33 = vld [vmem:[#allocation5 + $0xf] ss:$0 sm:$0xff] }
 0x249   :  { %v890_v47 = vpop.eup %889  ;;  %v772_v48 = vpack.c.bf16 %v584_v38, %v583_v13  ;;  %v558_v28 = vadd.f32 %v704_v19, %v494_v39  ;;  %v422_v49 = vmul.f32 %v888_v42, %v1086_v29  ;;  %v396_v51 = vadd.f32 1e-05, %v380_v41 }
 0x24a   :  { %v419_v24 = vmul.f32 %v890_v47, %v1092_v36  ;;  %v565_v55 = vadd.f32 %v708_v43, %v501_v46 }
 0x24b   :  { %788 = vst [vmem:[#allocation8 + $0x28] sm:$0xff] %v772_v48   ;;  %v574_v54 = vmax.f32 %v558_v28, 0.0  ;;  %v502_v57 = vmul.f32 %v700_v31, %v422_v49  ;;  %903 = vrsqrt.f32 %v396_v51 }
 0x24c   :  { %v892_v5 = vpop.eup %891  ;;  %v499_v59 = vmul.f32 %v699_v50, %v419_v24  ;;  %v581_v4 = vmax.f32 %v565_v55, 0.0 }
 0x24d   :  { %v894_v1 = vpop.eup %893  ;;  %v747_v62 = vpack.c.bf16 %v574_v54, %v573_v53  ;;  %v566_v2 = vadd.f32 %v708_v43, %v502_v57  ;;  %v420_v3 = vmul.f32 %v892_v5, %v1097_v40 }
 0x24e   :  { %v417_v29 = vmul.f32 %v894_v1, %v1102_v44  ;;  %v563_v36 = vadd.f32 %v707_v58, %v499_v59 }
 0x24f   :  { %748 = vst [vmem:[#allocation8] sm:$0xff] %v747_v62   ;;  %v582_v6 = vmax.f32 %v566_v2, 0.0  ;;  %v500_v7 = vmul.f32 %v699_v50, %v420_v3 }
 0x250   :  { %v896_v12 = vpop.eup %895  ;;  %v497_v9 = vmul.f32 %v698_v63, %v417_v29  ;;  %v579_v40 = vmax.f32 %v563_v36, 0.0 }
 0x251   :  { %v898_v10 = vpop.eup %897  ;;  %v767_v11 = vpack.c.bf16 %v582_v6, %v581_v4  ;;  %v564_v8 = vadd.f32 %v707_v58, %v500_v7  ;;  %v418_v14 = vmul.f32 %v896_v12, %v1105_v45 }
 0x252   :  { %v425_v16 = vmul.f32 %v898_v10, %v1112_v52  ;;  %v561_v44 = vadd.f32 %v706_v0, %v497_v9 }
 0x253   :  { %787 = vst [vmem:[#allocation8 + $0x20] sm:$0xff] %v767_v11   ;;  %v580_v17 = vmax.f32 %v564_v8, 0.0  ;;  %v498_v18 = vmul.f32 %v698_v63, %v418_v14 }
 0x254   :  { %v900_v19 = vpop.eup %899  ;;  %v505_v22 = vmul.f32 %v702_v15, %v425_v16  ;;  %v577_v45 = vmax.f32 %v561_v44, 0.0 }
 0x255   :  { %v902_v23 = vpop.eup %901  ;;  %v762_v25 = vpack.c.bf16 %v580_v17, %v579_v40  ;;  %v562_v26 = vadd.f32 %v706_v0, %v498_v18  ;;  %v426_v20 = vmul.f32 %v900_v19, %v1117_v56 }
 0x256   :  { %v427_v30 = vmul.f32 %v902_v23, %v1122_v60  ;;  %v569_v52 = vadd.f32 %v710_v21, %v505_v22 }
 0x257   :  { %786 = vst [vmem:[#allocation8 + $0x18] sm:$0xff] %v762_v25   ;;  %v578_v31 = vmax.f32 %v562_v26, 0.0  ;;  %v506_v32 = vmul.f32 %v702_v15, %v426_v20 }
 0x258   :  { %v904_v13 = vpop.eup %903  ;;  %v507_v34 = vmul.f32 %v703_v27, %v427_v30  ;;  %v585_v39 = vmax.f32 %v569_v52, 0.0 }
 0x259   :  { %v757_v35 = vpack.c.bf16 %v578_v31, %v577_v45  ;;  %v570_v37 = vadd.f32 %v710_v21, %v506_v32  ;;  %v428_v38 = vmul.f32 %v904_v13, %v1125_v61 }
 0x25a   :  { %v571_v42 = vadd.f32 %v711_v33, %v507_v34 }
 0x25b   :  { %785 = vst [vmem:[#allocation8 + $0x10] sm:$0xff] %v757_v35   ;;  %v586_v41 = vmax.f32 %v570_v37, 0.0  ;;  %v508_v56 = vmul.f32 %v703_v27, %v428_v38 }
 0x25c   :  { %v587_v60 = vmax.f32 %v571_v42, 0.0 }
 0x25d   :  { %v777_v43 = vpack.c.bf16 %v586_v41, %v585_v39  ;;  %v572_v46 = vadd.f32 %v711_v33, %v508_v56 }
 0x25f   :  { %789 = vst [vmem:[#allocation8 + $0x30] sm:$0xff] %v777_v43   ;;  %v588_v47 = vmax.f32 %v572_v46, 0.0 }
 0x261   :  { %v782_v48 = vpack.c.bf16 %v588_v47, %v587_v60 }
 0x263   :  { %790 = vst [vmem:[#allocation8 + $0x38] sm:$0xff] %v782_v48  }
 0x264   :  { %976 = shalt.err (!%p973_p5)
}
 0x265   :  { %680 = dma.vmem_to_hbm [thread:$0]  %s675_s9, 1024, %s1159_s4, [#allocation4], %s998_s5, %s998_s5, %s999_s6  }
 0x266   :  { %989 = dma.done.wait [#allocation4], 1024  }
 0x267   :  { %990 = vsyncadd [#allocation4], 4294966272 }
 0x268   :  { %684 = vsyncpa [#allocation3], 1 }
 0x269   :  { %685 = vsyncpa [#allocation6], 1 }
 0x26a   :  { %686 = vsyncpa [#allocation4], 1 }

// kernel: tpu_custom_call.1
= control target key start
LH: loop header
LB: loop body
LE: loop exit
PB: predicated region body
PF: predicated region fallthrough
CT: control target
= control target key end

     0   :  { %9 = vsyncpa [#allocation3], 0  ;;  %s1155_s0 = inlined_call_operand.hbm [shape: f32[8,16,128], index: 0, kind: input, shape index: {}]   ;;  %s1156_s1 = inlined_call_operand.hbm [shape: f32[8,1,256], index: 1, kind: input, shape index: {}]   ;;  %s1157_s2 = inlined_call_operand.hbm [shape: bf16[128,128], index: 2, kind: input, shape index: {}]   ;;  %s1158_s3 = inlined_call_operand.vmem [shape: f32[1,128], index: 3, kind: input, shape index: {}]   ;;  %s1159_s4 = inlined_call_operand.hbm [shape: bf16[8,16,128], index: 4, kind: output, shape index: {}]  }
   0x1   :  { %10 = vsyncpa [#allocation6], 0 }
   0x2   :  { %11 = vsyncpa [#allocation4], 0  ;;  %s991_s15 = smov [#allocation5]  }
   0x3   :  { %s29_s16 = sshll.u32 %s991_s15, 4  ;;  %s30_s16 = int_to_ptr.vmem [resolvable:$true] %s29_s16 }
   0x4   :  { %s913_s17 = scalar_lea.vmem %s30_s16, 256  ;;  %p918_p1 = scmp.lt.s32.totalorder %s30_s16, %s30_s16 }
   0x5   :  { %p914_p0 = scmp.ne.s32.totalorder %s30_s16, %s913_s17  ;;  %p919_p2 = scmp.lt.s32.totalorder %s913_s17, %s913_s17 }
   0x7   :  { %p920_p3 = por %p919_p2, %p918_p1 }
   0x9   :  { %p921_p4 = pnand %p920_p3, %p914_p0 }
   0xb   :  { %924 = shalt.err (!%p921_p4)
}
   0xc   :  { %s992_s18 = smov 32   ;;  %s993_s19 = smov 2  }
   0xd   :  { %35 = dma.hbm_to_vmem [thread:$0]  %s1156_s1, 256, %s30_s16, [#allocation6], %s992_s18, %s992_s18, %s993_s19  }
   0xe   :  { %s994_s22 = smov [#allocation2]  }
   0xf   :  { %s17_s23 = sshll.u32 %s994_s22, 4  ;;  %s18_s23 = int_to_ptr.vmem [resolvable:$true] %s17_s23 }
  0x10   :  { %s933_s24 = scalar_lea.vmem %s18_s23, 2048  ;;  %p938_p6 = scmp.lt.s32.totalorder %s18_s23, %s18_s23 }
  0x11   :  { %p934_p5 = scmp.ne.s32.totalorder %s18_s23, %s933_s24  ;;  %p939_p7 = scmp.lt.s32.totalorder %s933_s24, %s933_s24 }
  0x13   :  { %p940_p8 = por %p939_p7, %p938_p6 }
  0x15   :  { %p941_p9 = pnand %p940_p8, %p934_p5 }
  0x17   :  { %944 = shalt.err (!%p941_p9)
}
  0x18   :  { %s995_s25 = smov 128   ;;  %s996_s26 = smov 8  }
  0x19   :  { %23 = dma.hbm_to_vmem [thread:$0]  %s1155_s0, 2048, %s18_s23, [#allocation3], %s995_s25, %s995_s25, %s996_s26  }
  0x1a   :  { %s997_s29 = smov [#allocation7]  }
  0x1b   :  { %s41_s30 = sshll.u32 %s997_s29, 4  ;;  %s42_s30 = int_to_ptr.vmem [resolvable:$true] %s41_s30 }
  0x1c   :  { %s953_s1 = scalar_lea.vmem %s42_s30, 1024  ;;  %p958_p11 = scmp.lt.s32.totalorder %s42_s30, %s42_s30 }
  0x1d   :  { %p954_p10 = scmp.ne.s32.totalorder %s42_s30, %s953_s1  ;;  %p959_p12 = scmp.lt.s32.totalorder %s953_s1, %s953_s1 }
  0x1f   :  { %p960_p13 = por %p959_p12, %p958_p11 }
  0x21   :  { %p961_p0 = pnand %p960_p13, %p954_p10 }
  0x23   :  { %964 = shalt.err (!%p961_p0)
}
  0x24   :  { %s998_s5 = smov 64   ;;  %s999_s6 = smov 4  }
  0x25   :  { %47 = dma.hbm_to_vmem [thread:$0]  %s1157_s2, 1024, %s42_s30, [#allocation6], %s998_s5, %s998_s5, %s999_s6  }
  0x26   :  { %985 = dma.done.wait [#allocation3], 2048  }
  0x27   :  { %986 = vsyncadd [#allocation3], 4294965248 }
  0x28   :  { %987 = dma.done.wait [#allocation6], 1280  }
  0x29   :  { %988 = vsyncadd [#allocation6], 4294966016  ;;  %v865_v0 = vld [vmem:[#allocation7 + $0x38] sm:$0xff]   ;;  %v866_v1 = vld [vmem:[#allocation7 + $0x30] sm:$0xff]  }
  0x2a   :  { %807 = vmatprep.subr.bf16.mxu0 %v865_v0  ;;  %839 = vmatprep.subr.bf16.mxu1 %v865_v0  ;;  %v867_v2 = vld [vmem:[#allocation7 + $0x28] sm:$0xff]   ;;  %v868_v3 = vld [vmem:[#allocation7 + $0x20] sm:$0xff]   ;;  %v60_v4 = vld [vmem:[#allocation2] sm:$0xff] }
  0x2b   :  { %808 = vmatpush3.bf16.msra.mxu0 %v865_v0  ;;  %847 = vmatpush3.bf16.msra.mxu1 %v865_v0  ;;  %v61_v5 = vld [vmem:[#allocation2 + $0x8] sm:$0xff]  ;;  %v68_v6 = vld [vmem:[#allocation2 + $0x40] sm:$0xff]  ;;  %v871_v12 = vld [vmem:[#allocation7 + $0x8] sm:$0xff]  }
  0x2c   :  { %809 = vmatprep.subr.bf16.mxu0 %v866_v1  ;;  %840 = vmatprep.subr.bf16.mxu1 %v866_v1  ;;  %v76_v7 = vpack.c.bf16 %v61_v5, %v60_v4  ;;  %v69_v8 = vld [vmem:[#allocation2 + $0x48] sm:$0xff]  ;;  %v870_v11 = vld [vmem:[#allocation7 + $0x10] sm:$0xff]   ;;  %v872_v13 = vld [vmem:[#allocation7] sm:$0xff]  }
  0x2d   :  { %v80_v9 = vpack.c.bf16 %v69_v8, %v68_v6  ;;  %v869_v10 = vld [vmem:[#allocation7 + $0x18] sm:$0xff]   ;;  %v62_v14 = vld [vmem:[#allocation2 + $0x10] sm:$0xff]  ;;  %v63_v15 = vld [vmem:[#allocation2 + $0x18] sm:$0xff] }
  0x2e   :  { %823 = vmatprep.mubr.bf16.mxu0 %v76_v7  ;;  %v70_v16 = vld [vmem:[#allocation2 + $0x50] sm:$0xff]  ;;  %v71_v17 = vld [vmem:[#allocation2 + $0x58] sm:$0xff]  ;;  %v64_v18 = vld [vmem:[#allocation2 + $0x20] sm:$0xff]  ;;  %v77_v22 = vpack.c.bf16 %v63_v15, %v62_v14 }
  0x2f   :  { %810 = vmatpush3.bf16.msra.mxu0 %v866_v1  ;;  %848 = vmatpush3.bf16.msra.mxu1 %v866_v1  ;;  %v65_v19 = vld [vmem:[#allocation2 + $0x28] sm:$0xff]  ;;  %v72_v20 = vld [vmem:[#allocation2 + $0x60] sm:$0xff]  ;;  %v81_v23 = vpack.c.bf16 %v71_v17, %v70_v16  ;;  %v66_v26 = vld [vmem:[#allocation2 + $0x30] sm:$0xff] }
  0x30   :  { %811 = vmatprep.subr.bf16.mxu0 %v867_v2  ;;  %841 = vmatprep.subr.bf16.mxu1 %v867_v2  ;;  %v73_v21 = vld [vmem:[#allocation2 + $0x68] sm:$0xff]  ;;  %v78_v24 = vpack.c.bf16 %v65_v19, %v64_v18  ;;  %v67_v27 = vld [vmem:[#allocation2 + $0x38] sm:$0xff]  ;;  %v74_v28 = vld [vmem:[#allocation2 + $0x70] sm:$0xff] }
  0x31   :  { %831 = vmatprep.mubr.bf16.mxu1 %v80_v9  ;;  %v82_v25 = vpack.c.bf16 %v73_v21, %v72_v20  ;;  %v75_v29 = vld [vmem:[#allocation2 + $0x78] sm:$0xff]  ;;  %v79_v30 = vpack.c.bf16 %v67_v27, %v66_v26  ;;  %v687_v32 = vld [vmem:[%s1158_s3] ss:$0 sm:$0xff]  ;;  %s1000_s3 = smov [#allocation8]  }
  0x32   :  { %v83_v31 = vpack.c.bf16 %v75_v29, %v74_v28  ;;  %s674_s9 = sshll.u32 %s1000_s3, 4  ;;  %s675_s9 = int_to_ptr.vmem [resolvable:$true] %s674_s9 }
  0x33   :  { %812 = vmatpush3.bf16.msra.mxu0 %v867_v2  ;;  %849 = vmatpush3.bf16.msra.mxu1 %v867_v2  ;;  %s965_s10 = scalar_lea.vmem %s675_s9, 1024  ;;  %p970_p2 = scmp.lt.s32.totalorder %s675_s9, %s675_s9 }
  0x34   :  { %813 = vmatprep.subr.bf16.mxu0 %v868_v3  ;;  %842 = vmatprep.subr.bf16.mxu1 %v868_v3  ;;  %p966_p1 = scmp.ne.s32.totalorder %s675_s9, %s965_s10  ;;  %p971_p3 = scmp.lt.s32.totalorder %s965_s10, %s965_s10 }
  0x36   :  { %p972_p4 = por %p971_p3, %p970_p2 }
  0x37   :  { %814 = vmatpush3.bf16.msra.mxu0 %v868_v3  ;;  %850 = vmatpush3.bf16.msra.mxu1 %v868_v3 }
  0x38   :  { %815 = vmatprep.subr.bf16.mxu0 %v869_v10  ;;  %843 = vmatprep.subr.bf16.mxu1 %v869_v10  ;;  %p973_p5 = pnand %p972_p4, %p966_p1 }
  0x3b   :  { %816 = vmatpush3.bf16.msra.mxu0 %v869_v10  ;;  %851 = vmatpush3.bf16.msra.mxu1 %v869_v10 }
  0x3c   :  { %817 = vmatprep.subr.bf16.mxu0 %v870_v11  ;;  %844 = vmatprep.subr.bf16.mxu1 %v870_v11 }
  0x3f   :  { %818 = vmatpush3.bf16.msra.mxu0 %v870_v11  ;;  %852 = vmatpush3.bf16.msra.mxu1 %v870_v11 }
  0x40   :  { %819 = vmatprep.subr.bf16.mxu0 %v871_v12  ;;  %845 = vmatprep.subr.bf16.mxu1 %v871_v12 }
  0x43   :  { %820 = vmatpush3.bf16.msra.mxu0 %v871_v12  ;;  %853 = vmatpush3.bf16.msra.mxu1 %v871_v12 }
  0x44   :  { %821 = vmatprep.subr.bf16.mxu0 %v872_v13  ;;  %846 = vmatprep.subr.bf16.mxu1 %v872_v13 }
  0x47   :  { %822 = vmatpush3.bf16.msra.mxu0 %v872_v13  ;;  %854 = vmatpush3.bf16.msra.mxu1 %v872_v13 }
  0x4a   :  { %824 = vmatmul.mubr.bf16.vlgmr.msra.gmra.mxu0 %v77_v22  ;;  %832 = vmatmul.mubr.bf16.vlgmr.msra.gmra.mxu1 %v81_v23 }
  0x4b   :  { %827 = vmatprep.mubr.bf16.mxu0 %v78_v24  ;;  %835 = vmatprep.mubr.bf16.mxu1 %v82_v25 }
  0x52   :  { %828 = vmatmul.mubr.bf16.gmra.mxu0 %v79_v30  ;;  %836 = vmatmul.mubr.bf16.gmra.mxu1 %v83_v31 }
 0x10a   :  { %v825_v33 = vpop.f32.mrf.mxu0  ;;  %v833_v34 = vpop.f32.mrf.mxu1 }
 0x10b   :  { %v198_v35 = vadd.f32 %v825_v33, %v687_v32  ;;  %v230_v36 = vadd.f32 %v833_v34, %v687_v32 }
 0x10c   :  { %v189_v37 = vpop.f32.mrf.mxu0  ;;  %v221_v38 = vpop.f32.mrf.mxu1 }
 0x10d   :  { %272 = vadd.xlane.f32.xlu0 %v230_v36  ;;  %256 = vadd.xlane.f32.xlu1 %v198_v35  ;;  %v190_v41 = vadd.f32 %v687_v32, %v189_v37  ;;  %v222_v46 = vadd.f32 %v687_v32, %v221_v38 }
 0x10e   :  { %v826_v39 = vpop.f32.mrf.mxu0  ;;  %v834_v40 = vpop.f32.mrf.mxu1 }
 0x10f   :  { %v201_v42 = vadd.f32 %v826_v39, %v687_v32  ;;  %v233_v47 = vadd.f32 %v834_v40, %v687_v32 }
 0x110   :  { %v192_v43 = vpop.f32.mrf.mxu0  ;;  %v224_v44 = vpop.f32.mrf.mxu1 }
 0x111   :  { %258 = vadd.xlane.f32.xlu1 %v201_v42  ;;  %252 = vadd.xlane.f32.xlu0 %v190_v41  ;;  %v193_v50 = vadd.f32 %v687_v32, %v192_v43  ;;  %v225_v51 = vadd.f32 %v687_v32, %v224_v44 }
 0x112   :  { %v829_v45 = vpop.f32.mrf.mxu0  ;;  %v837_v49 = vpop.f32.mrf.mxu1 }
 0x113   :  { %v214_v54 = vadd.f32 %v829_v45, %v687_v32  ;;  %v1056_v63 = vadd.f32 %v837_v49, %v687_v32 }
 0x114   :  { %v205_v48 = vpop.f32.mrf.mxu0  ;;  %v237_v53 = vpop.f32.mrf.mxu1 }
 0x115   :  { %274 = vadd.xlane.f32.xlu1 %v233_v47  ;;  %268 = vadd.xlane.f32.xlu0 %v222_v46  ;;  %v1044_v58 = vadd.f32 %v687_v32, %v205_v48  ;;  %v1050_v61 = vadd.f32 %v687_v32, %v237_v53 }
 0x116   :  { %v830_v52 = vpop.f32.mrf.mxu0  ;;  %v838_v57 = vpop.f32.mrf.mxu1 }
 0x117   :  { %v1041_v55 = vadd.f32 %v830_v52, %v687_v32  ;;  %v1058_v0 = vadd.f32 %v838_v57, %v687_v32 }
 0x118   :  { %v208_v56 = vpop.f32.mrf.mxu0  ;;  %v240_v60 = vpop.f32.mrf.mxu1 }
 0x119   :  { %270 = vadd.xlane.f32.xlu1 %v225_v51  ;;  %254 = vadd.xlane.f32.xlu0 %v193_v50  ;;  %v1046_v59 = vadd.f32 %v687_v32, %v208_v56  ;;  %v1052_v62 = vadd.f32 %v687_v32, %v240_v60 }
 0x11d   :  { %266 = vadd.xlane.f32.xlu1 %v1041_v55  ;;  %264 = vadd.xlane.f32.xlu0 %v214_v54 }
 0x121   :  { %262 = vadd.xlane.f32.xlu1 %v1046_v59  ;;  %260 = vadd.xlane.f32.xlu0 %v1044_v58 }
 0x125   :  { %278 = vadd.xlane.f32.xlu1 %v1052_v62  ;;  %276 = vadd.xlane.f32.xlu0 %v1050_v61 }
 0x129   :  { %282 = vadd.xlane.f32.xlu1 %v1058_v0  ;;  %280 = vadd.xlane.f32.xlu0 %v1056_v63 }
 0x196   :  { %v273_v1 = vpop.xlane.xlu0 %272  ;;  %v257_v2 = vpop.xlane.xlu1 %256 }
 0x197   :  { %v295_v3 = vmul.f32 0.0078125, %v273_v1  ;;  %v287_v4 = vmul.f32 0.0078125, %v257_v2 }
 0x199   :  { %v1062_v5 = vsub.f32 %v198_v35, %v287_v4  ;;  %v1064_v8 = vsub.f32 %v230_v36, %v295_v3 }
 0x19a   :  { %v259_v6 = vpop.xlane.xlu1 %258  ;;  %v253_v7 = vpop.xlane.xlu0 %252 }
 0x19b   :  { %v288_v9 = vmul.f32 0.0078125, %v259_v6  ;;  %v285_v10 = vmul.f32 0.0078125, %v253_v7  ;;  %v319_v11 = vmul.f32 %v1062_v5, %v1062_v5  ;;  %v327_v19 = vmul.f32 %v1064_v8, %v1064_v8 }
 0x19d   :  { %v1068_v12 = vsub.f32 %v201_v42, %v288_v9  ;;  %337 = vadd.xlane.f32.xlu0 %v319_v11  ;;  %v1070_v13 = vsub.f32 %v190_v41, %v285_v10 }
 0x19e   :  { %v275_v14 = vpop.xlane.xlu1 %274  ;;  %v269_v15 = vpop.xlane.xlu0 %268 }
 0x19f   :  { %v296_v16 = vmul.f32 0.0078125, %v275_v14  ;;  %v293_v17 = vmul.f32 0.0078125, %v269_v15  ;;  %v320_v18 = vmul.f32 %v1068_v12, %v1068_v12  ;;  %v317_v23 = vmul.f32 %v1070_v13, %v1070_v13 }
 0x1a1   :  { %v1076_v20 = vsub.f32 %v233_v47, %v296_v16  ;;  %339 = vadd.xlane.f32.xlu1 %v320_v18  ;;  %353 = vadd.xlane.f32.xlu0 %v327_v19  ;;  %v1080_v24 = vsub.f32 %v222_v46, %v293_v17 }
 0x1a2   :  { %v271_v21 = vpop.xlane.xlu1 %270  ;;  %v255_v22 = vpop.xlane.xlu0 %254 }
 0x1a3   :  { %v294_v25 = vmul.f32 0.0078125, %v271_v21  ;;  %v286_v26 = vmul.f32 0.0078125, %v255_v22  ;;  %v328_v27 = vmul.f32 %v1076_v20, %v1076_v20  ;;  %v325_v34 = vmul.f32 %v1080_v24, %v1080_v24 }
 0x1a5   :  { %v1084_v28 = vsub.f32 %v193_v50, %v286_v26  ;;  %355 = vadd.xlane.f32.xlu1 %v328_v27  ;;  %333 = vadd.xlane.f32.xlu0 %v317_v23  ;;  %v1086_v29 = vsub.f32 %v225_v51, %v294_v25 }
 0x1a6   :  { %v267_v30 = vpop.xlane.xlu1 %266  ;;  %v265_v31 = vpop.xlane.xlu0 %264 }
 0x1a7   :  { %v292_v32 = vmul.f32 0.0078125, %v267_v30  ;;  %v291_v33 = vmul.f32 0.0078125, %v265_v31  ;;  %v318_v35 = vmul.f32 %v1084_v28, %v1084_v28  ;;  %v326_v39 = vmul.f32 %v1086_v29, %v1086_v29 }
 0x1a9   :  { %v1092_v36 = vsub.f32 %v214_v54, %v291_v33  ;;  %349 = vadd.xlane.f32.xlu0 %v325_v34  ;;  %335 = vadd.xlane.f32.xlu1 %v318_v35  ;;  %v1097_v40 = vsub.f32 %v1041_v55, %v292_v32  ;;  %v697_v35 = vld [vmem:[#allocation5 + $0x2] ss:$0 sm:$0xff] }
 0x1aa   :  { %v263_v37 = vpop.xlane.xlu1 %262  ;;  %v261_v38 = vpop.xlane.xlu0 %260 }
 0x1ab   :  { %v290_v41 = vmul.f32 0.0078125, %v263_v37  ;;  %v289_v42 = vmul.f32 0.0078125, %v261_v38  ;;  %v323_v43 = vmul.f32 %v1092_v36, %v1092_v36  ;;  %v324_v50 = vmul.f32 %v1097_v40, %v1097_v40 }
 0x1ad   :  { %v1102_v44 = vsub.f32 %v1044_v58, %v289_v42  ;;  %351 = vadd.xlane.f32.xlu1 %v326_v39  ;;  %345 = vadd.xlane.f32.xlu0 %v323_v43  ;;  %v1105_v45 = vsub.f32 %v1046_v59, %v290_v41  ;;  %v705_v43 = vld [vmem:[#allocation5 + $0x3] ss:$0 sm:$0xff] }
 0x1ae   :  { %v279_v46 = vpop.xlane.xlu1 %278  ;;  %v277_v47 = vpop.xlane.xlu0 %276 }
 0x1af   :  { %v298_v48 = vmul.f32 0.0078125, %v279_v46  ;;  %v297_v49 = vmul.f32 0.0078125, %v277_v47  ;;  %v321_v51 = vmul.f32 %v1102_v44, %v1102_v44  ;;  %v322_v55 = vmul.f32 %v1105_v45, %v1105_v45 }
 0x1b1   :  { %v1112_v52 = vsub.f32 %v1050_v61, %v297_v49  ;;  %347 = vadd.xlane.f32.xlu1 %v324_v50  ;;  %341 = vadd.xlane.f32.xlu0 %v321_v51  ;;  %v1117_v56 = vsub.f32 %v1052_v62, %v298_v48 }
 0x1b2   :  { %v283_v53 = vpop.xlane.xlu1 %282  ;;  %v281_v54 = vpop.xlane.xlu0 %280 }
 0x1b3   :  { %v300_v57 = vmul.f32 0.0078125, %v283_v53  ;;  %v299_v58 = vmul.f32 0.0078125, %v281_v54  ;;  %v329_v59 = vmul.f32 %v1112_v52, %v1112_v52  ;;  %v330_v1 = vmul.f32 %v1117_v56, %v1117_v56  ;;  %v701_v53 = vld [vmem:[#allocation5 + $0xa] ss:$0 sm:$0xff] }
 0x1b5   :  { %v1122_v60 = vsub.f32 %v1056_v63, %v299_v58  ;;  %343 = vadd.xlane.f32.xlu1 %v322_v55  ;;  %357 = vadd.xlane.f32.xlu0 %v329_v59  ;;  %v1125_v61 = vsub.f32 %v1058_v0, %v300_v57 }
 0x1b7   :  { %v331_v62 = vmul.f32 %v1122_v60, %v1122_v60  ;;  %v332_v2 = vmul.f32 %v1125_v61, %v1125_v61 }
 0x1b9   :  { %359 = vadd.xlane.f32.xlu1 %v330_v1  ;;  %361 = vadd.xlane.f32.xlu0 %v331_v62  ;;  %v709_v62 = vld [vmem:[#allocation5 + $0xb] ss:$0 sm:$0xff] }
 0x1bd   :  { %363 = vadd.xlane.f32.xlu1 %v332_v2 }
 0x226   :  { %v338_v3 = vpop.xlane.xlu0 %337 }
 0x227   :  { %v367_v63 = vmul.f32 0.0078125, %v338_v3 }
 0x229   :  { %v383_v4 = vadd.f32 1e-05, %v367_v63 }
 0x22a   :  { %v340_v6 = vpop.xlane.xlu1 %339  ;;  %v354_v7 = vpop.xlane.xlu0 %353 }
 0x22b   :  { %873 = vrsqrt.f32 %v383_v4  ;;  %v368_v0 = vmul.f32 0.0078125, %v340_v6  ;;  %v375_v9 = vmul.f32 0.0078125, %v354_v7 }
 0x22d   :  { %v384_v10 = vadd.f32 1e-05, %v368_v0  ;;  %v391_v11 = vadd.f32 1e-05, %v375_v9  ;;  %v696_v0 = vld [vmem:[#allocation5] ss:$0 sm:$0xff] }
 0x22e   :  { %v356_v14 = vpop.xlane.xlu1 %355  ;;  %v334_v15 = vpop.xlane.xlu0 %333 }
 0x22f   :  { %875 = vrsqrt.f32 %v384_v10  ;;  %v376_v16 = vmul.f32 0.0078125, %v356_v14  ;;  %v365_v17 = vmul.f32 0.0078125, %v334_v15 }
 0x230   :  { %877 = vrsqrt.f32 %v391_v11 }
 0x231   :  { %v392_v18 = vadd.f32 1e-05, %v376_v16  ;;  %v381_v19 = vadd.f32 1e-05, %v365_v17 }
 0x232   :  { %v336_v21 = vpop.xlane.xlu1 %335  ;;  %v350_v22 = vpop.xlane.xlu0 %349 }
 0x233   :  { %879 = vrsqrt.f32 %v392_v18  ;;  %v366_v23 = vmul.f32 0.0078125, %v336_v21  ;;  %v373_v25 = vmul.f32 0.0078125, %v350_v22 }
 0x234   :  { %881 = vrsqrt.f32 %v381_v19  ;;  %v704_v19 = vld [vmem:[#allocation5 + $0x1] ss:$0 sm:$0xff] }
 0x235   :  { %v382_v26 = vadd.f32 1e-05, %v366_v23  ;;  %v389_v27 = vadd.f32 1e-05, %v373_v25 }
 0x236   :  { %v352_v30 = vpop.xlane.xlu1 %351  ;;  %v346_v31 = vpop.xlane.xlu0 %345 }
 0x237   :  { %883 = vrsqrt.f32 %v382_v26  ;;  %v374_v32 = vmul.f32 0.0078125, %v352_v30  ;;  %v371_v33 = vmul.f32 0.0078125, %v346_v31  ;;  %v700_v31 = vld [vmem:[#allocation5 + $0x8] ss:$0 sm:$0xff] }
 0x238   :  { %v874_v34 = vpop.eup %873  ;;  %885 = vrsqrt.f32 %v389_v27 }
 0x239   :  { %v415_v37 = vmul.f32 %v874_v34, %v1062_v5  ;;  %v390_v38 = vadd.f32 1e-05, %v374_v32  ;;  %v387_v39 = vadd.f32 1e-05, %v371_v33 }
 0x23a   :  { %v348_v41 = vpop.xlane.xlu1 %347  ;;  %v342_v42 = vpop.xlane.xlu0 %341 }
 0x23b   :  { %v495_v46 = vmul.f32 %v697_v35, %v415_v37  ;;  %887 = vrsqrt.f32 %v390_v38  ;;  %v372_v47 = vmul.f32 0.0078125, %v348_v41  ;;  %v369_v48 = vmul.f32 0.0078125, %v342_v42 }
 0x23c   :  { %v876_v49 = vpop.eup %875  ;;  %889 = vrsqrt.f32 %v387_v39 }
 0x23d   :  { %v878_v50 = vpop.eup %877  ;;  %v416_v51 = vmul.f32 %v876_v49, %v1068_v12  ;;  %v388_v54 = vadd.f32 1e-05, %v372_v47  ;;  %v385_v55 = vadd.f32 1e-05, %v369_v48  ;;  %v559_v57 = vadd.f32 %v705_v43, %v495_v46 }
 0x23e   :  { %v423_v5 = vmul.f32 %v878_v50, %v1064_v8  ;;  %v344_v58 = vpop.xlane.xlu1 %343  ;;  %v358_v59 = vpop.xlane.xlu0 %357  ;;  %v699_v50 = vld [vmem:[#allocation5 + $0x6] ss:$0 sm:$0xff] }
 0x23f   :  { %v496_v1 = vmul.f32 %v697_v35, %v416_v51  ;;  %891 = vrsqrt.f32 %v388_v54  ;;  %v370_v2 = vmul.f32 0.0078125, %v344_v58  ;;  %v377_v4 = vmul.f32 0.0078125, %v358_v59  ;;  %v707_v58 = vld [vmem:[#allocation5 + $0x7] ss:$0 sm:$0xff] }
 0x240   :  { %v880_v3 = vpop.eup %879  ;;  %v503_v63 = vmul.f32 %v701_v53, %v423_v5  ;;  %893 = vrsqrt.f32 %v385_v55  ;;  %v575_v10 = vmax.f32 %v559_v57, 0.0 }
 0x241   :  { %v882_v6 = vpop.eup %881  ;;  %v560_v7 = vadd.f32 %v705_v43, %v496_v1  ;;  %v424_v12 = vmul.f32 %v880_v3, %v1076_v20  ;;  %v386_v9 = vadd.f32 1e-05, %v370_v2  ;;  %v393_v14 = vadd.f32 1e-05, %v377_v4  ;;  %v708_v43 = vld [vmem:[#allocation5 + $0x9] ss:$0 sm:$0xff] }
 0x242   :  { %v567_v11 = vadd.f32 %v709_v62, %v503_v63  ;;  %v413_v8 = vmul.f32 %v882_v6, %v1070_v13  ;;  %v360_v15 = vpop.xlane.xlu1 %359  ;;  %v362_v16 = vpop.xlane.xlu0 %361  ;;  %v698_v63 = vld [vmem:[#allocation5 + $0x4] ss:$0 sm:$0xff] }
 0x243   :  { %v576_v17 = vmax.f32 %v560_v7, 0.0  ;;  %v504_v18 = vmul.f32 %v701_v53, %v424_v12  ;;  %895 = vrsqrt.f32 %v386_v9  ;;  %v378_v21 = vmul.f32 0.0078125, %v360_v15  ;;  %v702_v15 = vld [vmem:[#allocation5 + $0xc] ss:$0 sm:$0xff] }
 0x244   :  { %v884_v22 = vpop.eup %883  ;;  %v493_v23 = vmul.f32 %v696_v0, %v413_v8  ;;  %897 = vrsqrt.f32 %v393_v14  ;;  %v379_v25 = vmul.f32 0.0078125, %v362_v16  ;;  %v583_v13 = vmax.f32 %v567_v11, 0.0 }
 0x245   :  { %v886_v26 = vpop.eup %885  ;;  %v752_v20 = vpack.c.bf16 %v576_v17, %v575_v10  ;;  %v568_v27 = vadd.f32 %v709_v62, %v504_v18  ;;  %v414_v30 = vmul.f32 %v884_v22, %v1084_v28  ;;  %v394_v32 = vadd.f32 1e-05, %v378_v21  ;;  %v710_v21 = vld [vmem:[#allocation5 + $0xd] ss:$0 sm:$0xff] }
 0x246   :  { %v557_v33 = vadd.f32 %v704_v19, %v493_v23  ;;  %v421_v34 = vmul.f32 %v886_v26, %v1080_v24  ;;  %v395_v35 = vadd.f32 1e-05, %v379_v25  ;;  %v364_v37 = vpop.xlane.xlu1 %363 }
 0x247   :  { %784 = vst [vmem:[#allocation8 + $0x8] sm:$0xff] %v752_v20   ;;  %v584_v38 = vmax.f32 %v568_v27, 0.0  ;;  %v494_v39 = vmul.f32 %v696_v0, %v414_v30  ;;  %899 = vrsqrt.f32 %v394_v32  ;;  %v380_v41 = vmul.f32 0.0078125, %v364_v37  ;;  %v706_v0 = vld [vmem:[#allocation5 + $0x5] ss:$0 sm:$0xff] }
 0x248   :  { %v888_v42 = vpop.eup %887  ;;  %v501_v46 = vmul.f32 %v700_v31, %v421_v34  ;;  %901 = vrsqrt.f32 %v395_v35  ;;  %v573_v53 = vmax.f32 %v557_v33, 0.0  ;;  %v703_v27 = vld [vmem:[#allocation5 + $0xe] ss:$0 sm:$0xff]  ;;  %v711_v33 = vld [vmem:[#allocation5 + $0xf] ss:$0 sm:$0xff] }
 0x249   :  { %v890_v47 = vpop.eup %889  ;;  %v772_v48 = vpack.c.bf16 %v584_v38, %v583_v13  ;;  %v558_v28 = vadd.f32 %v704_v19, %v494_v39  ;;  %v422_v49 = vmul.f32 %v888_v42, %v1086_v29  ;;  %v396_v51 = vadd.f32 1e-05, %v380_v41 }
 0x24a   :  { %v419_v24 = vmul.f32 %v890_v47, %v1092_v36  ;;  %v565_v55 = vadd.f32 %v708_v43, %v501_v46 }
 0x24b   :  { %788 = vst [vmem:[#allocation8 + $0x28] sm:$0xff] %v772_v48   ;;  %v574_v54 = vmax.f32 %v558_v28, 0.0  ;;  %v502_v57 = vmul.f32 %v700_v31, %v422_v49  ;;  %903 = vrsqrt.f32 %v396_v51 }
 0x24c   :  { %v892_v5 = vpop.eup %891  ;;  %v499_v59 = vmul.f32 %v699_v50, %v419_v24  ;;  %v581_v4 = vmax.f32 %v565_v55, 0.0 }
 0x24d   :  { %v894_v1 = vpop.eup %893  ;;  %v747_v62 = vpack.c.bf16 %v574_v54, %v573_v53  ;;  %v566_v2 = vadd.f32 %v708_v43, %v502_v57  ;;  %v420_v3 = vmul.f32 %v892_v5, %v1097_v40 }
 0x24e   :  { %v417_v29 = vmul.f32 %v894_v1, %v1102_v44  ;;  %v563_v36 = vadd.f32 %v707_v58, %v499_v59 }
 0x24f   :  { %748 = vst [vmem:[#allocation8] sm:$0xff] %v747_v62   ;;  %v582_v6 = vmax.f32 %v566_v2, 0.0  ;;  %v500_v7 = vmul.f32 %v699_v50, %v420_v3 }
 0x250   :  { %v896_v12 = vpop.eup %895  ;;  %v497_v9 = vmul.f32 %v698_v63, %v417_v29  ;;  %v579_v40 = vmax.f32 %v563_v36, 0.0 }
 0x251   :  { %v898_v10 = vpop.eup %897  ;;  %v767_v11 = vpack.c.bf16 %v582_v6, %v581_v4  ;;  %v564_v8 = vadd.f32 %v707_v58, %v500_v7  ;;  %v418_v14 = vmul.f32 %v896_v12, %v1105_v45 }
 0x252   :  { %v425_v16 = vmul.f32 %v898_v10, %v1112_v52  ;;  %v561_v44 = vadd.f32 %v706_v0, %v497_v9 }
 0x253   :  { %787 = vst [vmem:[#allocation8 + $0x20] sm:$0xff] %v767_v11   ;;  %v580_v17 = vmax.f32 %v564_v8, 0.0  ;;  %v498_v18 = vmul.f32 %v698_v63, %v418_v14 }
 0x254   :  { %v900_v19 = vpop.eup %899  ;;  %v505_v22 = vmul.f32 %v702_v15, %v425_v16  ;;  %v577_v45 = vmax.f32 %v561_v44, 0.0 }
 0x255   :  { %v902_v23 = vpop.eup %901  ;;  %v762_v25 = vpack.c.bf16 %v580_v17, %v579_v40  ;;  %v562_v26 = vadd.f32 %v706_v0, %v498_v18  ;;  %v426_v20 = vmul.f32 %v900_v19, %v1117_v56 }
 0x256   :  { %v427_v30 = vmul.f32 %v902_v23, %v1122_v60  ;;  %v569_v52 = vadd.f32 %v710_v21, %v505_v22 }
 0x257   :  { %786 = vst [vmem:[#allocation8 + $0x18] sm:$0xff] %v762_v25   ;;  %v578_v31 = vmax.f32 %v562_v26, 0.0  ;;  %v506_v32 = vmul.f32 %v702_v15, %v426_v20 }
 0x258   :  { %v904_v13 = vpop.eup %903  ;;  %v507_v34 = vmul.f32 %v703_v27, %v427_v30  ;;  %v585_v39 = vmax.f32 %v569_v52, 0.0 }
 0x259   :  { %v757_v35 = vpack.c.bf16 %v578_v31, %v577_v45  ;;  %v570_v37 = vadd.f32 %v710_v21, %v506_v32  ;;  %v428_v38 = vmul.f32 %v904_v13, %v1125_v61 }
 0x25a   :  { %v571_v42 = vadd.f32 %v711_v33, %v507_v34 }
 0x25b   :  { %785 = vst [vmem:[#allocation8 + $0x10] sm:$0xff] %v757_v35   ;;  %v586_v41 = vmax.f32 %v570_v37, 0.0  ;;  %v508_v56 = vmul.f32 %v703_v27, %v428_v38 }
 0x25c   :  { %v587_v60 = vmax.f32 %v571_v42, 0.0 }
 0x25d   :  { %v777_v43 = vpack.c.bf16 %v586_v41, %v585_v39  ;;  %v572_v46 = vadd.f32 %v711_v33, %v508_v56 }
 0x25f   :  { %789 = vst [vmem:[#allocation8 + $0x30] sm:$0xff] %v777_v43   ;;  %v588_v47 = vmax.f32 %v572_v46, 0.0 }
 0x261   :  { %v782_v48 = vpack.c.bf16 %v588_v47, %v587_v60 }
 0x263   :  { %790 = vst [vmem:[#allocation8 + $0x38] sm:$0xff] %v782_v48  }
 0x264   :  { %976 = shalt.err (!%p973_p5)
}
 0x265   :  { %680 = dma.vmem_to_hbm [thread:$0]  %s675_s9, 1024, %s1159_s4, [#allocation4], %s998_s5, %s998_s5, %s999_s6  }
 0x266   :  { %989 = dma.done.wait [#allocation4], 1024  }
 0x267   :  { %990 = vsyncadd [#allocation4], 4294966272 }
 0x268   :  { %684 = vsyncpa [#allocation3], 1 }
 0x269   :  { %685 = vsyncpa [#allocation6], 1 }
 0x26a   :  { %686 = vsyncpa [#allocation4], 1 }

</bundles_post_ra>
